<compile_context>
chip_gen: v5e
topology: v5e:2x2
jax: 0.10.0
libtpu: 0.0.40
codegen_flags: <defaults>
</compile_context>

<pallas_src>
import functools

import jax
import jax.numpy as jnp
from jax import lax
from jax.experimental import pallas as pl
from jax.experimental.pallas import tpu as pltpu

EPS = 1e-5   # nn.BatchNorm2d default eps
KS = 3       # ConvBlock default: kernel_size=3, stride=1, padding=1


def conv_stats_kernel(xw_ref, wt_ref, red_ref, y_ref, st_ref):
    """Pass 1: 3x3 conv for one (batch, row-tile) + per-tile BN partial stats.

    xw_ref:  (1, 1, TH+2, Wp*Cin)  lane-dense padded input window (with halo)
    wt_ref:  (KS, Wp*Cin, W*Cout)  block-Toeplitz weights (kw + Cout folded in)
    red_ref: (W*Cout, Cout)        0/1 per-channel reduction matrix
    y_ref:   (1, TH, W*Cout)       pre-BN conv output, lane-dense
    st_ref:  (1, 1, 2, Cout)       per-tile [sum, sum-of-squares] per channel
    """
    TH = y_ref.shape[1]
    xw = xw_ref[0, 0]                                      # (TH+2, Wp*Cin)

    # One MXU matmul per kh row tap, accumulated in f32.  kw taps and the Cout
    # projection live inside the Toeplitz weight -> no im2col, no relayout.
    acc = jnp.dot(xw[0:TH, :], wt_ref[0], preferred_element_type=jnp.float32)
    for kh in range(1, KS):
        acc = acc + jnp.dot(xw[kh:kh + TH, :], wt_ref[kh],
                            preferred_element_type=jnp.float32)

    y_ref[...] = acc.reshape(y_ref.shape)

    # Single-pass BN partial statistics (combined across tiles outside).
    # Row-reduce on the XLU, then gather per-channel with a tiny 0/1 matmul so
    # no lane->sublane relayout is needed.
    col = jnp.sum(acc, axis=0, keepdims=True)              # (1, W*Cout)
    colsq = jnp.sum(acc * acc, axis=0, keepdims=True)      # (1, W*Cout)
    both = jnp.concatenate([col, colsq], axis=0)           # (2, W*Cout)
    st = jnp.dot(both, red_ref[...], preferred_element_type=jnp.float32)
    st_ref[...] = st.reshape(st_ref.shape)


def bn_relu_nchw_kernel(y_ref, s_ref, t_ref, sel_ref, o_ref):
    """Pass 2: fused BN affine + ReLU + direct NCHW writeback.

    y_ref: (1, TH, W*Cout);  s_ref / t_ref: (1, W*Cout) per-channel scale/shift
    sel_ref: (Cout, W*Cout, W) 0/1 channel-extraction matrices
    o_ref: (1, Cout, TH, W)   final output block, already NCHW
    """
    z = jnp.maximum(y_ref[0] * s_ref[...] + t_ref[...], 0.0)   # (TH, W*Cout)
    for co in range(o_ref.shape[1]):
        # Pure 0/1 selection matmul: channel co as (TH, W), written straight
        # into the NCHW block.  Uses the idle MXU instead of a lane->sublane
        # transpose/relayout, and removes the XLA-side output transpose pass.
        o_ref[0, co, :, :] = jnp.dot(z, sel_ref[co],
                                     preferred_element_type=jnp.float32)


def _pick_tile_h(H):
    """Largest sensible row tile: full H for small images, halve if huge."""
    th = H
    while th > 512 and th % 2 == 0 and (th // 2) % 8 == 0 and H % (th // 2) == 0:
        th //= 2
    return th


@functools.partial(jax.jit, static_argnames=("tile_h",))
def conv_block(x_nchw, w_oihw, bias, gamma, beta, *, tile_h=None):
    """Pallas ConvBlock forward: (N, Cin, H, W) f32 -> (N, Cout, H, W) f32."""
    del bias  # cancels exactly under training-mode BatchNorm (see header)
    N, Cin, H, W = x_nchw.shape
    Cout = w_oihw.shape[0]
    TH = tile_h if tile_h is not None else _pick_tile_h(H)
    assert H % TH == 0 and (TH == H or TH % 8 == 0), "row tile must divide H"
    n_tiles = H // TH
    Hp, Wp = H + (KS - 1), W + (KS - 1)
    WC_in, WC = Wp * Cin, W * Cout

    f32 = jnp.float32
    x = x_nchw.astype(f32)
    w = w_oihw.astype(f32)

    # ---- Layout glue (input side): pad + lane-dense pack + per-tile windows.
    # TODO(synk): fold the NCHW->NHWC transpose + zero pad into kernel 1 via
    # edge masking to save these XLA passes over x on bandwidth-bound sizes.
    x_nhwc = jnp.transpose(x, (0, 2, 3, 1))                   # (N, H, W, Cin)
    xp = jnp.pad(x_nhwc, ((0, 0), (1, 1), (1, 1), (0, 0)))    # (N, Hp, Wp, Cin)
    xp = xp.reshape(N, Hp, WC_in)                             # lane-dense input
    if n_tiles == 1:
        xg = xp[:, None]                                      # (N, 1, Hp, Wp*Cin)
    else:
        xg = jnp.stack([xp[:, j * TH:j * TH + TH + KS - 1]
                        for j in range(n_tiles)], axis=1)     # (N, nt, TH+2, Wp*Cin)

    # ---- Block-Toeplitz conv weight: fold kw taps + Cout projection into K/N.
    # wt[kh, c*Cin+ci, w*Cout+co] = W[co, ci, kh, c-w] if 0 <= c-w < KS else 0.
    # Built with exact elementwise f32 ops (no matmul => no precision loss).
    # TODO(synk): for large W*Cin / W*Cout switch to per-tap (kh,kw) matmul
    # accumulation over a blocked W instead of this dense Toeplitz weight.
    wk = jnp.transpose(w, (2, 3, 1, 0))                       # (kh, kw, ci, co)
    mask = (jnp.arange(Wp)[None, :, None]
            == jnp.arange(W)[None, None, :] + jnp.arange(KS)[:, None, None])
    mask = mask.astype(f32)                                   # (kw, c, w)
    wt = jnp.sum(mask[None, :, :, None, :, None] * wk[:, :, None, :, None, :],
                 axis=1)                                      # (kh, c, ci, w, co)
    wt = wt.reshape(KS, WC_in, WC)

    # Exact 0/1 helper matrices: per-channel reduction and channel extraction.
    red = jnp.tile(jnp.eye(Cout, dtype=f32), (W, 1))          # (W*Cout, Cout)
    sel = (jnp.eye(Cout, dtype=f32)[:, None, :, None]
           * jnp.eye(W, dtype=f32)[None, :, None, :]).reshape(Cout, WC, W)

    grid = (N, n_tiles)
    cparams = pltpu.CompilerParams(
        dimension_semantics=("parallel", "parallel"),
        # Explicit scoped-VMEM budget; re-derive when TH/W/C grow (v7x: 64 MiB/TC).
        vmem_limit_bytes=32 * 1024 * 1024,
    )

    # ---- Pass 1: conv (3 MXU matmuls per tile) + per-tile BN partial stats.
    y, stats = pl.pallas_call(
        conv_stats_kernel,
        out_shape=(
            jax.ShapeDtypeStruct((N, H, WC), f32),
            jax.ShapeDtypeStruct((N, n_tiles, 2, Cout), f32),
        ),
        grid=grid,
        in_specs=[
            pl.BlockSpec((1, 1, TH + KS - 1, WC_in), lambda n, j: (n, j, 0, 0)),
            pl.BlockSpec((KS, WC_in, WC), lambda n, j: (0, 0, 0)),
            pl.BlockSpec((WC, Cout), lambda n, j: (0, 0)),
        ],
        out_specs=(
            pl.BlockSpec((1, TH, WC), lambda n, j: (n, j, 0)),
            pl.BlockSpec((1, 1, 2, Cout), lambda n, j: (n, j, 0, 0)),
        ),
        compiler_params=cparams,
    )(xg, wt, red)

    # ---- Tiny cross-tile combine: batch mean / biased var -> scale + shift.
    cnt = jnp.float32(N * H * W)
    sums = jnp.sum(stats, axis=(0, 1))                        # (2, Cout)
    mean = sums[0] / cnt
    var = jnp.maximum(sums[1] / cnt - mean * mean, 0.0)       # guard cancellation
    s = gamma.astype(f32) * lax.rsqrt(var + EPS)
    t = beta.astype(f32) - mean * s
    s_row = jnp.tile(s, W).reshape(1, WC)
    t_row = jnp.tile(t, W).reshape(1, WC)

    # ---- Pass 2: fused BN affine + ReLU + direct NCHW writeback.
    # TODO(synk): on v5e store y in bf16 (halves the y HBM round trip) and on
    # v6e/v7x cast pass-1 matmul operands to bf16 when the accuracy budget
    # allows; kept f32 here to match the f32 reference tightly.
    out = pl.pallas_call(
        bn_relu_nchw_kernel,
        out_shape=jax.ShapeDtypeStruct((N, Cout, H, W), f32),
        grid=grid,
        in_specs=[
            pl.BlockSpec((1, TH, WC), lambda n, j: (n, j, 0)),
            pl.BlockSpec((1, WC), lambda n, j: (0, 0)),
            pl.BlockSpec((1, WC), lambda n, j: (0, 0)),
            pl.BlockSpec((Cout, WC, W), lambda n, j: (0, 0, 0)),
        ],
        out_specs=pl.BlockSpec((1, Cout, TH, W), lambda n, j: (n, 0, j, 0)),
        compiler_params=cparams,
    )(y, s_row, t_row, sel)

    return out


def reference(x_nchw, w_oihw, bias, gamma, beta):
    """Pure-JAX reference (includes the conv bias) for correctness checking."""
    out = lax.conv_general_dilated(
        x_nchw, w_oihw, window_strides=(1, 1), padding=((1, 1), (1, 1)),
        dimension_numbers=("NCHW", "OIHW", "NCHW"),
        precision=lax.Precision.HIGHEST,
    ) + bias[None, :, None, None]
    mean = jnp.mean(out, axis=(0, 2, 3), keepdims=True)
    var = jnp.mean((out - mean) ** 2, axis=(0, 2, 3), keepdims=True)
    out = (out - mean) * lax.rsqrt(var + EPS)
    out = out * gamma[None, :, None, None] + beta[None, :, None, None]
    return jnp.maximum(out, 0.0)


if __name__ == "__main__":
    key = jax.random.PRNGKey(0)
    N, Cin, Cout, H, W = 2, 4, 8, 16, 16
    k_x, k_w, k_b = jax.random.split(key, 3)

    # Deterministic parameter init mirroring the module's __init__:
    # xavier_uniform_ for conv weight, default uniform for conv bias,
    # BN weight = 1, BN bias = 0.
    fan_in = Cin * KS * KS
    fan_out = Cout * KS * KS
    limit = (6.0 / (fan_in + fan_out)) ** 0.5
    w = jax.random.uniform(k_w, (Cout, Cin, KS, KS), jnp.float32, -limit, limit)
    b_bound = 1.0 / (fan_in ** 0.5)
    b = jax.random.uniform(k_b, (Cout,), jnp.float32, -b_bound, b_bound)
    gamma = jnp.ones((Cout,), jnp.float32)
    beta = jnp.zeros((Cout,), jnp.float32)

    x = jax.random.normal(k_x, (N, Cin, H, W), jnp.float32)

    out = jax.block_until_ready(conv_block(x, w, b, gamma, beta))
    ref = reference(x, w, b, gamma, beta)

    assert out.shape == (N, Cout, H, W)
    assert jnp.allclose(out, ref, atol=5e-4, rtol=5e-4), "mismatch vs JAX reference"

    print("KERNEL_OK")
</pallas_src>

<mosaic_0001>
module attributes {stable_mosaic.version = 11 : i64} {
  func.func @conv_stats_kernel(%arg0: i32, %arg1: i32, %arg2: memref<1x1x18x72xf32, #tpu.memory_space<vmem>>, %arg3: memref<3x72x128xf32, #tpu.memory_space<vmem>>, %arg4: memref<128x8xf32, #tpu.memory_space<vmem>>, %arg5: memref<1x16x128xf32, #tpu.memory_space<vmem>>, %arg6: memref<1x1x2x8xf32, #tpu.memory_space<vmem>>) attributes {dimension_semantics = [#tpu.dimension_semantics<parallel>, #tpu.dimension_semantics<parallel>], iteration_bounds = array<i64: 2, 1>, scalar_prefetch = 0 : i64, scratch_operands = 0 : i64, tpu.core_type = #tpu.core_type<tc>, window_params = [{transform_indices = @transform_0, window_bounds = array<i64: 1, 1, 18, 72>}, {pipeline_mode = #tpu.pipeline_mode<synchronous>, transform_indices = @transform_1, window_bounds = array<i64: 3, 72, 128>}, {pipeline_mode = #tpu.pipeline_mode<synchronous>, transform_indices = @transform_2, window_bounds = array<i64: 128, 8>}, {transform_indices = @transform_3, window_bounds = array<i64: 1, 16, 128>}, {transform_indices = @transform_4, window_bounds = array<i64: 1, 1, 2, 8>}]} {
    %c0 = arith.constant 0 : index
    %c0_0 = arith.constant 0 : index
    %c0_1 = arith.constant 0 : index
    %c0_2 = arith.constant 0 : index
    %0 = vector.load %arg2[%c0, %c0_0, %c0_1, %c0_2] : memref<1x1x18x72xf32, #tpu.memory_space<vmem>>, vector<1x1x18x72xf32>
    %1 = vector.shape_cast %0 : vector<1x1x18x72xf32> to vector<18x72xf32>
    %2 = vector.extract_strided_slice %1 {offsets = [0, 0], sizes = [16, 72], strides = [1, 1]} : vector<18x72xf32> to vector<16x72xf32>
    %c0_3 = arith.constant 0 : index
    %c0_4 = arith.constant 0 : index
    %c0_5 = arith.constant 0 : index
    %3 = vector.load %arg3[%c0_3, %c0_4, %c0_5] : memref<3x72x128xf32, #tpu.memory_space<vmem>>, vector<1x72x128xf32>
    %4 = vector.shape_cast %3 : vector<1x72x128xf32> to vector<72x128xf32>
    %cst = arith.constant dense<0.000000e+00> : vector<16x128xf32>
    %5 = tpu.matmul %2, %4, %cst {dimension_numbers = #tpu.dot_dimension_numbers<[1], [0], [0], [1], [0, 0, 1, 1], [], []>} : vector<16x72xf32>, vector<72x128xf32>, vector<16x128xf32> -> vector<16x128xf32>
    %6 = vector.extract_strided_slice %1 {offsets = [1, 0], sizes = [16, 72], strides = [1, 1]} : vector<18x72xf32> to vector<16x72xf32>
    %c1 = arith.constant 1 : index
    %c0_6 = arith.constant 0 : index
    %c0_7 = arith.constant 0 : index
    %7 = vector.load %arg3[%c1, %c0_6, %c0_7] : memref<3x72x128xf32, #tpu.memory_space<vmem>>, vector<1x72x128xf32>
    %8 = vector.shape_cast %7 : vector<1x72x128xf32> to vector<72x128xf32>
    %cst_8 = arith.constant dense<0.000000e+00> : vector<16x128xf32>
    %9 = tpu.matmul %6, %8, %cst_8 {dimension_numbers = #tpu.dot_dimension_numbers<[1], [0], [0], [1], [0, 0, 1, 1], [], []>} : vector<16x72xf32>, vector<72x128xf32>, vector<16x128xf32> -> vector<16x128xf32>
    %10 = arith.addf %5, %9 : vector<16x128xf32>
    %11 = vector.extract_strided_slice %1 {offsets = [2, 0], sizes = [16, 72], strides = [1, 1]} : vector<18x72xf32> to vector<16x72xf32>
    %c2 = arith.constant 2 : index
    %c0_9 = arith.constant 0 : index
    %c0_10 = arith.constant 0 : index
    %12 = vector.load %arg3[%c2, %c0_9, %c0_10] : memref<3x72x128xf32, #tpu.memory_space<vmem>>, vector<1x72x128xf32>
    %13 = vector.shape_cast %12 : vector<1x72x128xf32> to vector<72x128xf32>
    %cst_11 = arith.constant dense<0.000000e+00> : vector<16x128xf32>
    %14 = tpu.matmul %11, %13, %cst_11 {dimension_numbers = #tpu.dot_dimension_numbers<[1], [0], [0], [1], [0, 0, 1, 1], [], []>} : vector<16x72xf32>, vector<72x128xf32>, vector<16x128xf32> -> vector<16x128xf32>
    %15 = arith.addf %10, %14 : vector<16x128xf32>
    %16 = vector.shape_cast %15 : vector<16x128xf32> to vector<1x16x128xf32>
    %c0_12 = arith.constant 0 : index
    %c0_13 = arith.constant 0 : index
    %c0_14 = arith.constant 0 : index
    %17 = vector.load %arg5[%c0_12, %c0_13, %c0_14] : memref<1x16x128xf32, #tpu.memory_space<vmem>>, vector<1x16x128xf32>
    tpu.vector_store %arg5[%c0_12, %c0_13, %c0_14], %16 {strides = array<i32>} : memref<1x16x128xf32, #tpu.memory_space<vmem>>, vector<1x16x128xf32>,
    %cst_15 = arith.constant dense<0.000000e+00> : vector<128xf32>
    %18 = vector.multi_reduction <add>, %15, %cst_15 [0] : vector<16x128xf32> to vector<128xf32>
    %19 = vector.shape_cast %18 : vector<128xf32> to vector<1x128xf32>
    %20 = arith.mulf %15, %15 : vector<16x128xf32>
    %cst_16 = arith.constant dense<0.000000e+00> : vector<128xf32>
    %21 = vector.multi_reduction <add>, %20, %cst_16 [0] : vector<16x128xf32> to vector<128xf32>
    %22 = vector.shape_cast %21 : vector<128xf32> to vector<1x128xf32>
    %23 = tpu.concatenate %19, %22 in 0 : vector<1x128xf32>, vector<1x128xf32> -> vector<2x128xf32>
    %c0_17 = arith.constant 0 : index
    %c0_18 = arith.constant 0 : index
    %24 = vector.load %arg4[%c0_17, %c0_18] : memref<128x8xf32, #tpu.memory_space<vmem>>, vector<128x8xf32>
    %cst_19 = arith.constant dense<0.000000e+00> : vector<2x8xf32>
    %25 = tpu.matmul %23, %24, %cst_19 {dimension_numbers = #tpu.dot_dimension_numbers<[1], [0], [0], [1], [0, 0, 1, 1], [], []>} : vector<2x128xf32>, vector<128x8xf32>, vector<2x8xf32> -> vector<2x8xf32>
    %26 = vector.shape_cast %25 : vector<2x8xf32> to vector<1x1x2x8xf32>
    %c0_20 = arith.constant 0 : index
    %c0_21 = arith.constant 0 : index
    %c0_22 = arith.constant 0 : index
    %c0_23 = arith.constant 0 : index
    %27 = vector.load %arg6[%c0_20, %c0_21, %c0_22, %c0_23] : memref<1x1x2x8xf32, #tpu.memory_space<vmem>>, vector<1x1x2x8xf32>
    tpu.vector_store %arg6[%c0_20, %c0_21, %c0_22, %c0_23], %26 {strides = array<i32>} : memref<1x1x2x8xf32, #tpu.memory_space<vmem>>, vector<1x1x2x8xf32>,
    return
  }
  func.func @transform_0(%arg0: i32, %arg1: i32) -> (i32, i32, i32, i32) {
    %c0_i32 = arith.constant 0 : i32
    %c0_i32_0 = arith.constant 0 : i32
    %c0_i32_1 = arith.constant 0 : i32
    return %arg0, %arg1, %c0_i32, %c0_i32_0 : i32, i32, i32, i32
  }
  func.func @transform_1(%arg0: i32, %arg1: i32) -> (i32, i32, i32) {
    %c0_i32 = arith.constant 0 : i32
    %c0_i32_0 = arith.constant 0 : i32
    %c0_i32_1 = arith.constant 0 : i32
    %c0_i32_2 = arith.constant 0 : i32
    return %c0_i32, %c0_i32_0, %c0_i32_1 : i32, i32, i32
  }
  func.func @transform_2(%arg0: i32, %arg1: i32) -> (i32, i32) {
    %c0_i32 = arith.constant 0 : i32
    %c0_i32_0 = arith.constant 0 : i32
    %c0_i32_1 = arith.constant 0 : i32
    return %c0_i32, %c0_i32_0 : i32, i32
  }
  func.func @transform_3(%arg0: i32, %arg1: i32) -> (i32, i32, i32) {
    %c0_i32 = arith.constant 0 : i32
    %c0_i32_0 = arith.constant 0 : i32
    return %arg0, %arg1, %c0_i32 : i32, i32, i32
  }
  func.func @transform_4(%arg0: i32, %arg1: i32) -> (i32, i32, i32, i32) {
    %c0_i32 = arith.constant 0 : i32
    %c0_i32_0 = arith.constant 0 : i32
    %c0_i32_1 = arith.constant 0 : i32
    return %arg0, %arg1, %c0_i32, %c0_i32_0 : i32, i32, i32, i32
  }
}

module attributes {stable_mosaic.version = 11 : i64} {
  func.func @bn_relu_nchw_kernel(%arg0: i32, %arg1: i32, %arg2: memref<1x16x128xf32, #tpu.memory_space<vmem>>, %arg3: memref<1x128xf32, #tpu.memory_space<vmem>>, %arg4: memref<1x128xf32, #tpu.memory_space<vmem>>, %arg5: memref<8x128x16xf32, #tpu.memory_space<vmem>>, %arg6: memref<1x8x16x16xf32, #tpu.memory_space<vmem>>) attributes {dimension_semantics = [#tpu.dimension_semantics<parallel>, #tpu.dimension_semantics<parallel>], iteration_bounds = array<i64: 2, 1>, scalar_prefetch = 0 : i64, scratch_operands = 0 : i64, tpu.core_type = #tpu.core_type<tc>, window_params = [{transform_indices = @transform_0, window_bounds = array<i64: 1, 16, 128>}, {pipeline_mode = #tpu.pipeline_mode<synchronous>, transform_indices = @transform_1, window_bounds = array<i64: 1, 128>}, {pipeline_mode = #tpu.pipeline_mode<synchronous>, transform_indices = @transform_2, window_bounds = array<i64: 1, 128>}, {pipeline_mode = #tpu.pipeline_mode<synchronous>, transform_indices = @transform_3, window_bounds = array<i64: 8, 128, 16>}, {transform_indices = @transform_4, window_bounds = array<i64: 1, 8, 16, 16>}]} {
    %c0 = arith.constant 0 : index
    %c0_0 = arith.constant 0 : index
    %c0_1 = arith.constant 0 : index
    %0 = vector.load %arg2[%c0, %c0_0, %c0_1] : memref<1x16x128xf32, #tpu.memory_space<vmem>>, vector<1x16x128xf32>
    %1 = vector.shape_cast %0 : vector<1x16x128xf32> to vector<16x128xf32>
    %c0_2 = arith.constant 0 : index
    %c0_3 = arith.constant 0 : index
    %2 = vector.load %arg3[%c0_2, %c0_3] : memref<1x128xf32, #tpu.memory_space<vmem>>, vector<1x128xf32>
    %3 = vector.broadcast %2 : vector<1x128xf32> to vector<16x128xf32>
    %4 = arith.mulf %1, %3 : vector<16x128xf32>
    %c0_4 = arith.constant 0 : index
    %c0_5 = arith.constant 0 : index
    %5 = vector.load %arg4[%c0_4, %c0_5] : memref<1x128xf32, #tpu.memory_space<vmem>>, vector<1x128xf32>
    %6 = vector.broadcast %5 : vector<1x128xf32> to vector<16x128xf32>
    %7 = arith.addf %4, %6 : vector<16x128xf32>
    %cst = arith.constant 0.000000e+00 : f32
    %8 = vector.broadcast %cst : f32 to vector<16x128xf32>
    %9 = arith.maximumf %7, %8 : vector<16x128xf32>
    %c0_6 = arith.constant 0 : index
    %c0_7 = arith.constant 0 : index
    %c0_8 = arith.constant 0 : index
    %10 = vector.load %arg5[%c0_6, %c0_7, %c0_8] : memref<8x128x16xf32, #tpu.memory_space<vmem>>, vector<1x128x16xf32>
    %11 = vector.shape_cast %10 : vector<1x128x16xf32> to vector<128x16xf32>
    %cst_9 = arith.constant dense<0.000000e+00> : vector<16x16xf32>
    %12 = tpu.matmul %9, %11, %cst_9 {dimension_numbers = #tpu.dot_dimension_numbers<[1], [0], [0], [1], [0, 0, 1, 1], [], []>} : vector<16x128xf32>, vector<128x16xf32>, vector<16x16xf32> -> vector<16x16xf32>
    %c0_10 = arith.constant 0 : index
    %c0_11 = arith.constant 0 : index
    %c0_12 = arith.constant 0 : index
    %c0_13 = arith.constant 0 : index
    %13 = vector.load %arg6[%c0_10, %c0_11, %c0_12, %c0_13] : memref<1x8x16x16xf32, #tpu.memory_space<vmem>>, vector<1x1x16x16xf32>
    %14 = vector.shape_cast %13 : vector<1x1x16x16xf32> to vector<16x16xf32>
    %15 = vector.shape_cast %12 : vector<16x16xf32> to vector<1x1x16x16xf32>
    tpu.vector_store %arg6[%c0_10, %c0_11, %c0_12, %c0_13], %15 {strides = array<i32>} : memref<1x8x16x16xf32, #tpu.memory_space<vmem>>, vector<1x1x16x16xf32>,
    %c1 = arith.constant 1 : index
    %c0_14 = arith.constant 0 : index
    %c0_15 = arith.constant 0 : index
    %16 = vector.load %arg5[%c1, %c0_14, %c0_15] : memref<8x128x16xf32, #tpu.memory_space<vmem>>, vector<1x128x16xf32>
    %17 = vector.shape_cast %16 : vector<1x128x16xf32> to vector<128x16xf32>
    %cst_16 = arith.constant dense<0.000000e+00> : vector<16x16xf32>
    %18 = tpu.matmul %9, %17, %cst_16 {dimension_numbers = #tpu.dot_dimension_numbers<[1], [0], [0], [1], [0, 0, 1, 1], [], []>} : vector<16x128xf32>, vector<128x16xf32>, vector<16x16xf32> -> vector<16x16xf32>
    %c0_17 = arith.constant 0 : index
    %c1_18 = arith.constant 1 : index
    %c0_19 = arith.constant 0 : index
    %c0_20 = arith.constant 0 : index
    %19 = vector.load %arg6[%c0_17, %c1_18, %c0_19, %c0_20] : memref<1x8x16x16xf32, #tpu.memory_space<vmem>>, vector<1x1x16x16xf32>
    %20 = vector.shape_cast %19 : vector<1x1x16x16xf32> to vector<16x16xf32>
    %21 = vector.shape_cast %18 : vector<16x16xf32> to vector<1x1x16x16xf32>
    tpu.vector_store %arg6[%c0_17, %c1_18, %c0_19, %c0_20], %21 {strides = array<i32>} : memref<1x8x16x16xf32, #tpu.memory_space<vmem>>, vector<1x1x16x16xf32>,
    %c2 = arith.constant 2 : index
    %c0_21 = arith.constant 0 : index
    %c0_22 = arith.constant 0 : index
    %22 = vector.load %arg5[%c2, %c0_21, %c0_22] : memref<8x128x16xf32, #tpu.memory_space<vmem>>, vector<1x128x16xf32>
    %23 = vector.shape_cast %22 : vector<1x128x16xf32> to vector<128x16xf32>
    %cst_23 = arith.constant dense<0.000000e+00> : vector<16x16xf32>
    %24 = tpu.matmul %9, %23, %cst_23 {dimension_numbers = #tpu.dot_dimension_numbers<[1], [0], [0], [1], [0, 0, 1, 1], [], []>} : vector<16x128xf32>, vector<128x16xf32>, vector<16x16xf32> -> vector<16x16xf32>
    %c0_24 = arith.constant 0 : index
    %c2_25 = arith.constant 2 : index
    %c0_26 = arith.constant 0 : index
    %c0_27 = arith.constant 0 : index
    %25 = vector.load %arg6[%c0_24, %c2_25, %c0_26, %c0_27] : memref<1x8x16x16xf32, #tpu.memory_space<vmem>>, vector<1x1x16x16xf32>
    %26 = vector.shape_cast %25 : vector<1x1x16x16xf32> to vector<16x16xf32>
    %27 = vector.shape_cast %24 : vector<16x16xf32> to vector<1x1x16x16xf32>
    tpu.vector_store %arg6[%c0_24, %c2_25, %c0_26, %c0_27], %27 {strides = array<i32>} : memref<1x8x16x16xf32, #tpu.memory_space<vmem>>, vector<1x1x16x16xf32>,
    %c3 = arith.constant 3 : index
    %c0_28 = arith.constant 0 : index
    %c0_29 = arith.constant 0 : index
    %28 = vector.load %arg5[%c3, %c0_28, %c0_29] : memref<8x128x16xf32, #tpu.memory_space<vmem>>, vector<1x128x16xf32>
    %29 = vector.shape_cast %28 : vector<1x128x16xf32> to vector<128x16xf32>
    %cst_30 = arith.constant dense<0.000000e+00> : vector<16x16xf32>
    %30 = tpu.matmul %9, %29, %cst_30 {dimension_numbers = #tpu.dot_dimension_numbers<[1], [0], [0], [1], [0, 0, 1, 1], [], []>} : vector<16x128xf32>, vector<128x16xf32>, vector<16x16xf32> -> vector<16x16xf32>
    %c0_31 = arith.constant 0 : index
    %c3_32 = arith.constant 3 : index
    %c0_33 = arith.constant 0 : index
    %c0_34 = arith.constant 0 : index
    %31 = vector.load %arg6[%c0_31, %c3_32, %c0_33, %c0_34] : memref<1x8x16x16xf32, #tpu.memory_space<vmem>>, vector<1x1x16x16xf32>
    %32 = vector.shape_cast %31 : vector<1x1x16x16xf32> to vector<16x16xf32>
    %33 = vector.shape_cast %30 : vector<16x16xf32> to vector<1x1x16x16xf32>
    tpu.vector_store %arg6[%c0_31, %c3_32, %c0_33, %c0_34], %33 {strides = array<i32>} : memref<1x8x16x16xf32, #tpu.memory_space<vmem>>, vector<1x1x16x16xf32>,
    %c4 = arith.constant 4 : index
    %c0_35 = arith.constant 0 : index
    %c0_36 = arith.constant 0 : index
    %34 = vector.load %arg5[%c4, %c0_35, %c0_36] : memref<8x128x16xf32, #tpu.memory_space<vmem>>, vector<1x128x16xf32>
    %35 = vector.shape_cast %34 : vector<1x128x16xf32> to vector<128x16xf32>
    %cst_37 = arith.constant dense<0.000000e+00> : vector<16x16xf32>
    %36 = tpu.matmul %9, %35, %cst_37 {dimension_numbers = #tpu.dot_dimension_numbers<[1], [0], [0], [1], [0, 0, 1, 1], [], []>} : vector<16x128xf32>, vector<128x16xf32>, vector<16x16xf32> -> vector<16x16xf32>
    %c0_38 = arith.constant 0 : index
    %c4_39 = arith.constant 4 : index
    %c0_40 = arith.constant 0 : index
    %c0_41 = arith.constant 0 : index
    %37 = vector.load %arg6[%c0_38, %c4_39, %c0_40, %c0_41] : memref<1x8x16x16xf32, #tpu.memory_space<vmem>>, vector<1x1x16x16xf32>
    %38 = vector.shape_cast %37 : vector<1x1x16x16xf32> to vector<16x16xf32>
    %39 = vector.shape_cast %36 : vector<16x16xf32> to vector<1x1x16x16xf32>
    tpu.vector_store %arg6[%c0_38, %c4_39, %c0_40, %c0_41], %39 {strides = array<i32>} : memref<1x8x16x16xf32, #tpu.memory_space<vmem>>, vector<1x1x16x16xf32>,
    %c5 = arith.constant 5 : index
    %c0_42 = arith.constant 0 : index
    %c0_43 = arith.constant 0 : index
    %40 = vector.load %arg5[%c5, %c0_42, %c0_43] : memref<8x128x16xf32, #tpu.memory_space<vmem>>, vector<1x128x16xf32>
    %41 = vector.shape_cast %40 : vector<1x128x16xf32> to vector<128x16xf32>
    %cst_44 = arith.constant dense<0.000000e+00> : vector<16x16xf32>
    %42 = tpu.matmul %9, %41, %cst_44 {dimension_numbers = #tpu.dot_dimension_numbers<[1], [0], [0], [1], [0, 0, 1, 1], [], []>} : vector<16x128xf32>, vector<128x16xf32>, vector<16x16xf32> -> vector<16x16xf32>
    %c0_45 = arith.constant 0 : index
    %c5_46 = arith.constant 5 : index
    %c0_47 = arith.constant 0 : index
    %c0_48 = arith.constant 0 : index
    %43 = vector.load %arg6[%c0_45, %c5_46, %c0_47, %c0_48] : memref<1x8x16x16xf32, #tpu.memory_space<vmem>>, vector<1x1x16x16xf32>
    %44 = vector.shape_cast %43 : vector<1x1x16x16xf32> to vector<16x16xf32>
    %45 = vector.shape_cast %42 : vector<16x16xf32> to vector<1x1x16x16xf32>
    tpu.vector_store %arg6[%c0_45, %c5_46, %c0_47, %c0_48], %45 {strides = array<i32>} : memref<1x8x16x16xf32, #tpu.memory_space<vmem>>, vector<1x1x16x16xf32>,
    %c6 = arith.constant 6 : index
    %c0_49 = arith.constant 0 : index
    %c0_50 = arith.constant 0 : index
    %46 = vector.load %arg5[%c6, %c0_49, %c0_50] : memref<8x128x16xf32, #tpu.memory_space<vmem>>, vector<1x128x16xf32>
    %47 = vector.shape_cast %46 : vector<1x128x16xf32> to vector<128x16xf32>
    %cst_51 = arith.constant dense<0.000000e+00> : vector<16x16xf32>
    %48 = tpu.matmul %9, %47, %cst_51 {dimension_numbers = #tpu.dot_dimension_numbers<[1], [0], [0], [1], [0, 0, 1, 1], [], []>} : vector<16x128xf32>, vector<128x16xf32>, vector<16x16xf32> -> vector<16x16xf32>
    %c0_52 = arith.constant 0 : index
    %c6_53 = arith.constant 6 : index
    %c0_54 = arith.constant 0 : index
    %c0_55 = arith.constant 0 : index
    %49 = vector.load %arg6[%c0_52, %c6_53, %c0_54, %c0_55] : memref<1x8x16x16xf32, #tpu.memory_space<vmem>>, vector<1x1x16x16xf32>
    %50 = vector.shape_cast %49 : vector<1x1x16x16xf32> to vector<16x16xf32>
    %51 = vector.shape_cast %48 : vector<16x16xf32> to vector<1x1x16x16xf32>
    tpu.vector_store %arg6[%c0_52, %c6_53, %c0_54, %c0_55], %51 {strides = array<i32>} : memref<1x8x16x16xf32, #tpu.memory_space<vmem>>, vector<1x1x16x16xf32>,
    %c7 = arith.constant 7 : index
    %c0_56 = arith.constant 0 : index
    %c0_57 = arith.constant 0 : index
    %52 = vector.load %arg5[%c7, %c0_56, %c0_57] : memref<8x128x16xf32, #tpu.memory_space<vmem>>, vector<1x128x16xf32>
    %53 = vector.shape_cast %52 : vector<1x128x16xf32> to vector<128x16xf32>
    %cst_58 = arith.constant dense<0.000000e+00> : vector<16x16xf32>
    %54 = tpu.matmul %9, %53, %cst_58 {dimension_numbers = #tpu.dot_dimension_numbers<[1], [0], [0], [1], [0, 0, 1, 1], [], []>} : vector<16x128xf32>, vector<128x16xf32>, vector<16x16xf32> -> vector<16x16xf32>
    %c0_59 = arith.constant 0 : index
    %c7_60 = arith.constant 7 : index
    %c0_61 = arith.constant 0 : index
    %c0_62 = arith.constant 0 : index
    %55 = vector.load %arg6[%c0_59, %c7_60, %c0_61, %c0_62] : memref<1x8x16x16xf32, #tpu.memory_space<vmem>>, vector<1x1x16x16xf32>
    %56 = vector.shape_cast %55 : vector<1x1x16x16xf32> to vector<16x16xf32>
    %57 = vector.shape_cast %54 : vector<16x16xf32> to vector<1x1x16x16xf32>
    tpu.vector_store %arg6[%c0_59, %c7_60, %c0_61, %c0_62], %57 {strides = array<i32>} : memref<1x8x16x16xf32, #tpu.memory_space<vmem>>, vector<1x1x16x16xf32>,
    return
  }
  func.func @transform_0(%arg0: i32, %arg1: i32) -> (i32, i32, i32) {
    %c0_i32 = arith.constant 0 : i32
    %c0_i32_0 = arith.constant 0 : i32
    return %arg0, %arg1, %c0_i32 : i32, i32, i32
  }
  func.func @transform_1(%arg0: i32, %arg1: i32) -> (i32, i32) {
    %c0_i32 = arith.constant 0 : i32
    %c0_i32_0 = arith.constant 0 : i32
    %c0_i32_1 = arith.constant 0 : i32
    return %c0_i32, %c0_i32_0 : i32, i32
  }
  func.func @transform_2(%arg0: i32, %arg1: i32) -> (i32, i32) {
    %c0_i32 = arith.constant 0 : i32
    %c0_i32_0 = arith.constant 0 : i32
    %c0_i32_1 = arith.constant 0 : i32
    return %c0_i32, %c0_i32_0 : i32, i32
  }
  func.func @transform_3(%arg0: i32, %arg1: i32) -> (i32, i32, i32) {
    %c0_i32 = arith.constant 0 : i32
    %c0_i32_0 = arith.constant 0 : i32
    %c0_i32_1 = arith.constant 0 : i32
    %c0_i32_2 = arith.constant 0 : i32
    return %c0_i32, %c0_i32_0, %c0_i32_1 : i32, i32, i32
  }
  func.func @transform_4(%arg0: i32, %arg1: i32) -> (i32, i32, i32, i32) {
    %c0_i32 = arith.constant 0 : i32
    %c0_i32_0 = arith.constant 0 : i32
    %c0_i32_1 = arith.constant 0 : i32
    return %arg0, %c0_i32, %arg1, %c0_i32_0 : i32, i32, i32, i32
  }
}

</mosaic_0001>

<bundles_post_ra>
// kernel: conv_block.2
= control target key start
LH: loop header
LB: loop body
LE: loop exit
PB: predicated region body
PF: predicated region fallthrough
CT: control target
= control target key end

     0   :  { %s684_s15 = smov 0   ;;  %s686_s16 = smov 0   ;;  %s869_s0 = inlined_call_operand.vmem [shape: f32[2,1,18,72], index: 0, kind: input, shape index: {}]   ;;  %s870_s1 = inlined_call_operand.vmem [shape: f32[3,72,128], index: 1, kind: input, shape index: {}]   ;;  %s871_s2 = inlined_call_operand.vmem [shape: f32[128,8], index: 2, kind: input, shape index: {}]   ;;  %s872_s3 = inlined_call_operand.vmem [shape: f32[2,16,128], index: 3, kind: output, shape index: {0}]   ;;  %s873_s4 = inlined_call_operand.vmem [shape: f32[2,1,2,8], index: 4, kind: output, shape index: {1}]  }
   0x1   :  { %s688_s17 = smov 0  }
   0x2 LB: > { %s27_s18 = sadd.s32 1, %s653_s16  ;;  %p578_p0 = scmp.ge.s32.totalorder %s657_s17, 1  ;;  %s657_s17 = sphi %s688_s17, %s15_s17   ;;  %s653_s16 = sphi %s686_s16, %s875_s16   ;;  %s649_s15 = sphi %s684_s15, %s874_s15  }
   0x3   : > { %p29_p1 = scmp.ge.s32.totalorder %s27_s18, 2  ;;  %p187_p2 = scmp.lt.s32.totalorder %s657_s17, 3 }
   0x5   : > { %s877_s18 = smov (%p29_p1, %s27_s18), 0  ;;  %p188_p3 = pnand %p578_p0, %p187_p2 }
   0x6   : > { %p228_p4 = scmp.lt.s32.totalorder (!%p188_p3), %s649_s15, 1 }
   0x7   : > { %191 = sbr.rel (%p188_p3) target bundleno = 322 (0x142), region = 32 }
   0xc   : > { %v604_v0 = vld [vmem:[%s870_s1 + $0xd0] sm:$0xff]  ;;  %v603_v1 = vld [vmem:[%s870_s1 + $0xc8] sm:$0xff]  ;;  %v265_v3 = vld [vmem:[%s870_s1 + $0x40] sm:$0xff]  ;;  %s879_s15 = smov (!%p228_p4, %s649_s15), 1  ;;  %vm350_vm0 = vcmask 1045504   ;;  %vm279_vm1 = vcmask 1046528  }
   0xd   : > { %v591_v2 = vld [vmem:[%s870_s1 + $0x88] sm:$0xff]  ;;  %367 = vmatpush.msra.mxu2 %v604_v0  ;;  %v590_v4 = vld [vmem:[%s870_s1 + $0x80] sm:$0xff]  ;;  %324 = vmatpush.msra.mxu1 %v265_v3  ;;  %v264_v6 = vld [vmem:[%s870_s1 + $0x38] sm:$0xff]  ;;  %s610_s19 = smul.u32 24, %s879_s15  ;;  %vm285_vm2 = vcmask 588800   ;;  %s609_s21 = sshll.u32 %s879_s15, 4 }
   0xe   : > { %297 = vmatpush.msra.mxu0 %v591_v2  ;;  %v602_v5 = vld [vmem:[%s870_s1 + $0xc0] sm:$0xff]  ;;  %v589_v7 = vld [vmem:[%s870_s1 + $0x78] sm:$0xff]  ;;  %v263_v8 = vld [vmem:[%s870_s1 + $0x30] sm:$0xff]  ;;  %s245_s24 = scalar_lea.vmem %s872_s3, %s609_s21  ;;  %vm403_vm3 = vcmask 1040384   ;;  %s582_s25 = sshll.u32 %s879_s15, 1  ;;  %vm441_vm4 = vcmask 58368  }
   0xf   : > { %368 = vmatpush.msra.mxu2 %v603_v1  ;;  %325 = vmatpush.msra.mxu1 %v264_v6  ;;  %v601_v9 = vld [vmem:[%s870_s1 + $0xb8] sm:$0xff]  ;;  %v588_v10 = vld [vmem:[%s870_s1 + $0x70] sm:$0xff]  ;;  %v262_v11 = vld [vmem:[%s870_s1 + $0x28] sm:$0xff]  ;;  %s750_s28 = scalar_lea.vmem %s869_s0, %s610_s19  ;;  %s253_s29 = scalar_lea.vmem %s873_s4, %s582_s25 }
  0x10   : > { %298 = vmatpush.msra.mxu0 %v590_v4  ;;  %v600_v12 = vld [vmem:[%s870_s1 + $0xb0] sm:$0xff]  ;;  %v587_v13 = vld [vmem:[%s870_s1 + $0x68] sm:$0xff]  ;;  %v261_v15 = vld [vmem:[%s870_s1 + $0x20] sm:$0xff] }
  0x11   : > { %369 = vmatpush.msra.mxu2 %v602_v5  ;;  %326 = vmatpush.msra.mxu1 %v263_v8  ;;  %v599_v14 = vld [vmem:[%s870_s1 + $0xa8] sm:$0xff]  ;;  %v586_v16 = vld [vmem:[%s870_s1 + $0x60] sm:$0xff]  ;;  %v260_v19 = vld [vmem:[%s870_s1 + $0x18] sm:$0xff] }
  0x12   : > { %299 = vmatpush.msra.mxu0 %v589_v7  ;;  %v254_v17 = vld [vmem:[%s750_s28] sm:$0xff]  ;;  %v255_v18 = vld [vmem:[%s750_s28 + $0x8] sm:$0xff]  ;;  %v585_v21 = vld [vmem:[%s870_s1 + $0x58] sm:$0xff] }
  0x13   : > { %370 = vmatpush.msra.mxu2 %v601_v9  ;;  %327 = vmatpush.msra.mxu1 %v262_v11  ;;  %v598_v20 = vld [vmem:[%s870_s1 + $0xa0] sm:$0xff]  ;;  %v420_v22 = vld [vmem:[%s871_s2 + $0x78] sm:$0xff]  ;;  %v259_v23 = vld [vmem:[%s870_s1 + $0x10] sm:$0xff]  ;;  %v351_v24 = vrot.slane %v254_v17, 2  ;;  %v352_v25 = vrot.slane %v255_v18, 2  ;;  %v280_v28 = vrot.slane %v254_v17, 1 }
  0x14   : > { %300 = vmatpush.msra.mxu0 %v588_v10  ;;  %v597_v26 = vld [vmem:[%s870_s1 + $0x98] sm:$0xff]  ;;  %v584_v27 = vld [vmem:[%s870_s1 + $0x50] sm:$0xff]  ;;  %v281_v29 = vrot.slane %v255_v18, 1  ;;  %421 = vmatpush.msra.mxu3 %v420_v22  ;;  %v258_v30 = vld [vmem:[%s870_s1 + $0x8] sm:$0xff] }
  0x15   : > { %371 = vmatpush.msra.mxu2 %v600_v12  ;;  %328 = vmatpush.msra.mxu1 %v261_v15  ;;  %v596_v31 = vld [vmem:[%s870_s1 + $0x90] sm:$0xff]  ;;  %v583_v32 = vld [vmem:[%s870_s1 + $0x48] sm:$0xff]  ;;  %v353_v33 = vsel %vm350_vm0, %v351_v24, %v352_v25  ;;  %v257_v34 = vld [vmem:[%s870_s1] sm:$0xff] }
  0x16   : > { %301 = vmatpush.msra.mxu0 %v587_v13  ;;  %v282_v35 = vsel %vm279_vm1, %v280_v28, %v281_v29  ;;  %v256_v36 = vld [vmem:[%s750_s28 + $0x10] sm:$0x3]  ;;  %v418_v42 = vld [vmem:[%s871_s2 + $0x68] sm:$0xff]  ;;  %v417_v43 = vld [vmem:[%s871_s2 + $0x60] sm:$0xff] }
  0x17   : > { %372 = vmatpush.msra.mxu2 %v599_v14  ;;  %329 = vmatpush.msra.mxu1 %v260_v19  ;;  %v354_v37 = vrot.slane %v256_v36, 2  ;;  %v283_v38 = vrot.slane %v256_v36, 1  ;;  %v419_v41 = vld [vmem:[%s871_s2 + $0x70] sm:$0xff]  ;;  %v416_v44 = vld [vmem:[%s871_s2 + $0x58] sm:$0xff]  ;;  %v414_v46 = vld [vmem:[%s871_s2 + $0x48] sm:$0xff] }
  0x18   : > { %302 = vmatpush.msra.mxu0 %v586_v16  ;;  %422 = vmatpush.msra.mxu3 %v419_v41  ;;  %v415_v45 = vld [vmem:[%s871_s2 + $0x50] sm:$0xff]  ;;  %v413_v47 = vld [vmem:[%s871_s2 + $0x40] sm:$0xff]  ;;  %v412_v48 = vld [vmem:[%s871_s2 + $0x38] sm:$0xff] }
  0x19   : > { %373 = vmatpush.msra.mxu2 %v598_v20  ;;  %330 = vmatpush.msra.mxu1 %v259_v23  ;;  %v355_v39 = vsel %vm350_vm0, %v352_v25, %v354_v37  ;;  %v284_v40 = vsel %vm279_vm1, %v281_v29, %v283_v38  ;;  %v411_v49 = vld [vmem:[%s871_s2 + $0x30] sm:$0xff]  ;;  %v410_v50 = vld [vmem:[%s871_s2 + $0x28] sm:$0xff]  ;;  %v409_v51 = vld [vmem:[%s871_s2 + $0x20] sm:$0xff] }
  0x1a   : > { %303 = vmatpush.msra.mxu0 %v585_v21  ;;  %423 = vmatpush.msra.mxu3 %v418_v42  ;;  %v408_v52 = vld [vmem:[%s871_s2 + $0x18] sm:$0xff]  ;;  %v407_v53 = vld [vmem:[%s871_s2 + $0x10] sm:$0xff]  ;;  %v406_v54 = vld [vmem:[%s871_s2 + $0x8] sm:$0xff] }
  0x1b   : > { %374 = vmatpush.msra.mxu2 %v597_v26  ;;  %331 = vmatpush.msra.mxu1 %v258_v30  ;;  %v405_v55 = vld [vmem:[%s871_s2] sm:$0xff] }
  0x1c   : > { %304 = vmatpush.msra.mxu0 %v584_v27  ;;  %424 = vmatpush.msra.mxu3 %v417_v43 }
  0x1d   : > { %375 = vmatpush.msra.mxu2 %v596_v31  ;;  %332 = vmatpush.msra.mxu1 %v257_v34 }
  0x1e   : > { %305 = vmatpush.msra.mxu0 %v583_v32  ;;  %605 = vmatmul.msk.f32.vlgmr.msra.gmra.mxu2 %vm285_vm2, %v353_v33 }
  0x1f   : > { %592 = vmatmul.msk.f32.vlgmr.msra.gmra.mxu0 %vm285_vm2, %v282_v35  ;;  %594 = vmatmul.msk.f32.vlgmr.msra.gmra.mxu1 %vm285_vm2, %v254_v17 }
  0x20   : > { %425 = vmatpush.msra.mxu3 %v416_v44 }
  0x22   : > { %426 = vmatpush.msra.mxu3 %v415_v45 }
  0x24   : > { %427 = vmatpush.msra.mxu3 %v414_v46 }
  0x26   : > { %606 = vmatmul.msk.f32.gmra.mxu2 %vm285_vm2, %v355_v39  ;;  %428 = vmatpush.msra.mxu3 %v413_v47 }
  0x27   : > { %593 = vmatmul.msk.f32.gmra.mxu0 %vm285_vm2, %v284_v40  ;;  %595 = vmatmul.msk.f32.gmra.mxu1 %vm285_vm2, %v255_v18 }
  0x28   : > { %429 = vmatpush.msra.mxu3 %v412_v48 }
  0x2a   : > { %430 = vmatpush.msra.mxu3 %v411_v49 }
  0x2c   : > { %431 = vmatpush.msra.mxu3 %v410_v50 }
  0x2e   : > { %432 = vmatpush.msra.mxu3 %v409_v51 }
  0x30   : > { %433 = vmatpush.msra.mxu3 %v408_v52 }
  0x32   : > { %434 = vmatpush.msra.mxu3 %v407_v53 }
  0x34   : > { %435 = vmatpush.msra.mxu3 %v406_v54 }
  0x36   : > { %436 = vmatpush.msra.mxu3 %v405_v55 }
  0x9c   : > { %v307_v56 = vpop.f32.mrf.mxu0  ;;  %v334_v57 = vpop.f32.mrf.mxu1 }
  0x9d   : > { %v335_v58 = vadd.f32 %v334_v57, %v307_v56 }
  0xa1   : > { %v377_v59 = vpop.f32.mrf.mxu2 }
  0xa2   : > { %v383_v60 = vadd.f32 %v377_v59, %v335_v58 }
  0xa4   : > { %385 = vst [vmem:[%s245_s24] sm:$0xff] %v383_v60  ;;  %v310_v61 = vpop.f32.mrf.mxu0  ;;  %v337_v62 = vpop.f32.mrf.mxu1  ;;  %v394_v2 = vmul.f32 %v383_v60, %v383_v60 }
  0xa5   : > { %v338_v63 = vadd.f32 %v337_v62, %v310_v61 }
  0xa9   : > { %v380_v0 = vpop.f32.mrf.mxu2 }
  0xaa   : > { %v384_v1 = vadd.f32 %v380_v0, %v338_v63 }
  0xac   : > { %386 = vst [vmem:[%s245_s24 + $0x8] sm:$0xff] %v384_v1  ;;  %v387_v3 = vadd.f32 %v384_v1, %v383_v60  ;;  %v395_v4 = vmul.f32 %v384_v1, %v384_v1 }
  0xae   : > { %v388_v5 = vrot.slane %v387_v3, 4  ;;  %v396_v6 = vadd.f32 %v395_v4, %v394_v2 }
  0xb0   : > { %v389_v7 = vadd.f32 %v388_v5, %v387_v3  ;;  %v397_v8 = vrot.slane %v396_v6, 4 }
  0xb2   : > { %v390_v9 = vrot.slane %v389_v7, 2  ;;  %v398_v10 = vadd.f32 %v397_v8, %v396_v6 }
  0xb4   : > { %v391_v11 = vadd.f32 %v390_v9, %v389_v7  ;;  %v399_v12 = vrot.slane %v398_v10, 2 }
  0xb6   : > { %v392_v13 = vrot.slane %v391_v11, 1  ;;  %v400_v14 = vadd.f32 %v399_v12, %v398_v10 }
  0xb8   : > { %v401_v15 = vrot.slane %v400_v14, 1  ;;  %v393_v16 = vadd.f32 %v392_v13, %v391_v11 }
  0xba   : > { %v402_v17 = vadd.f32 %v401_v15, %v400_v14 }
  0xbc   : > { %v404_v18 = vsel %vm403_vm3, %v393_v16, %v402_v17 }
  0xbd   : > { %437 = vmatmul.f32.vlgmr.msra.gmra.mxu3 %v404_v18 }
 0x140   : > { %v438_v19 = vpop.f32.mrf.mxu3 }
 0x141   : > { %442 = vst.msk [vmem:[%s253_s29] sm:$0x3] %vm441_vm4, %v438_v19 }
 0x142 PF: > { %s15_s17 = sadd.s32 1, %s657_s17   ;;  %s874_s15 = smov %s653_s16 }
 0x143   : > { %p12_p5 = scmp.ge.s32.totalorder %s15_s17, 4   ;;  %s875_s16 = smov %s877_s18 }
 0x145   :  { %14 = sbr.rel (!%p12_p5) target bundleno = 2 (0x2), region = 76 }

// kernel: tile.23
= control target key start
LH: loop header
LB: loop body
LE: loop exit
PB: predicated region body
PF: predicated region fallthrough
CT: control target
= control target key end

     0   :  { %s28_s0 = inlined_call_operand.vmem [shape: f32[8], index: 0, kind: input, shape index: {}]   ;;  %s29_s1 = inlined_call_operand.vmem [shape: f32[16,8], index: 1, kind: output, shape index: {}]  }
   0x1   :  { %v4_v0 = vld [vmem:[%s28_s0] ss:$0 sm:$0xff] }
   0x2   :  { %5 = vst [vmem:[%s29_s1] sm:$0xff] %v4_v0 }
   0x3   :  { %8 = vst [vmem:[%s29_s1 + $0x8] sm:$0xff] %v4_v0 }

// kernel: tile.24
= control target key start
LH: loop header
LB: loop body
LE: loop exit
PB: predicated region body
PF: predicated region fallthrough
CT: control target
= control target key end

     0   :  { %s131_s10 = smov 120   ;;  %s132_s11 = smov 104   ;;  %vm3_vm0 = vcmask 64512   ;;  %vm9_vm1 = vcmask 1048512   ;;  %vm15_vm2 = vcmask 982912   ;;  %vm21_vm3 = vcmask 917312   ;;  %s207_s0 = inlined_call_operand.vmem [shape: f32[16,8], index: 0, kind: input, shape index: {}]   ;;  %s208_s1 = inlined_call_operand.vmem [shape: f32[1,128], index: 1, kind: output, shape index: {}]  }
   0x1   :  { %v101_v0 = vld [vmem:[%s207_s0 + $0xf] sm:$0x1]   ;;  %v103_v1 = vld [vmem:[%s207_s0 + $0xd] sm:$0x1]   ;;  %v105_v2 = vld [vmem:[%s207_s0 + $0xb] sm:$0x1]  }
   0x2   :  { %7 = vrot.lane.b32.xlu0 %v101_v0, %s131_s10  ;;  %19 = vrot.lane.b32.xlu1 %v103_v1, %s132_s11  ;;  %s133_s14 = smov 88   ;;  %v102_v3 = vld [vmem:[%s207_s0 + $0xe] sm:$0x1]   ;;  %v104_v4 = vld [vmem:[%s207_s0 + $0xc] sm:$0x1]   ;;  %s134_s19 = smov 112  }
   0x3   :  { %31 = vrot.lane.b32.xlu2 %v105_v2, %s133_s14  ;;  %s135_s20 = smov 96   ;;  %v106_v5 = vld [vmem:[%s207_s0 + $0xa] sm:$0x1]   ;;  %s136_s23 = smov 80   ;;  %v107_v6 = vld [vmem:[%s207_s0 + $0x9] sm:$0x1]  }
   0x4   :  { %v108_v7 = vld [vmem:[%s207_s0 + $0x8] sm:$0x1]   ;;  %s137_s28 = smov 72   ;;  %s138_s29 = smov 64   ;;  %v109_v8 = vld [vmem:[%s207_s0 + $0x7] sm:$0x1]  }
   0x5   :  { %s139_s3 = smov 56   ;;  %v110_v9 = vld [vmem:[%s207_s0 + $0x6] sm:$0x1]   ;;  %v111_v10 = vld [vmem:[%s207_s0 + $0x5] sm:$0x1]   ;;  %s140_s8 = smov 48  }
   0x6   :  { %s141_s9 = smov 40   ;;  %v112_v11 = vld [vmem:[%s207_s0 + $0x4] sm:$0x1]   ;;  %s142_s12 = smov 32   ;;  %v113_v12 = vld [vmem:[%s207_s0 + $0x3] sm:$0x1]  }
   0x7   :  { %v114_v13 = vld [vmem:[%s207_s0 + $0x2] sm:$0x1]   ;;  %s143_s17 = smov 24   ;;  %s144_s18 = smov 16   ;;  %v115_v14 = vld [vmem:[%s207_s0 + $0x1] sm:$0x1]  }
   0x8   :  { %s145_s21 = smov 8   ;;  %v2_v15 = vld [vmem:[%s207_s0] sm:$0x1]   ;;  %vm27_vm4 = vcmask 851712   ;;  %vm33_vm5 = vcmask 786112   ;;  %vm39_vm6 = vcmask 720512  }
   0x9   :  { %4 = vst.msk [vmem:[#allocation0] sm:$0x1] %vm3_vm0, %v2_v15   ;;  %vm45_vm7 = vcmask 654912   ;;  %vm51_vm8 = vcmask 589312   ;;  %vm57_vm9 = vcmask 523712   ;;  %vm63_vm10 = vcmask 458112  }
   0xa   :  { %13 = vrot.lane.b32.xlu0 %v102_v3, %s134_s19  ;;  %25 = vrot.lane.b32.xlu1 %v104_v4, %s135_s20  ;;  %vm69_vm11 = vcmask 392512   ;;  %vm75_vm12 = vcmask 326912   ;;  %vm81_vm13 = vcmask 261312   ;;  %vm87_vm14 = vcmask 195712  }
   0xb   :  { %37 = vrot.lane.b32.xlu2 %v106_v5, %s136_s23  ;;  %vm93_vm15 = vcmask 130112  }
  0x12   :  { %43 = vrot.lane.b32.xlu0 %v107_v6, %s137_s28  ;;  %49 = vrot.lane.b32.xlu1 %v108_v7, %s138_s29 }
  0x13   :  { %55 = vrot.lane.b32.xlu2 %v109_v8, %s139_s3 }
  0x1a   :  { %61 = vrot.lane.b32.xlu0 %v110_v9, %s140_s8  ;;  %67 = vrot.lane.b32.xlu1 %v111_v10, %s141_s9 }
  0x1b   :  { %73 = vrot.lane.b32.xlu2 %v112_v11, %s142_s12 }
  0x22   :  { %79 = vrot.lane.b32.xlu0 %v113_v12, %s143_s17  ;;  %85 = vrot.lane.b32.xlu1 %v114_v13, %s144_s18 }
  0x23   :  { %91 = vrot.lane.b32.xlu2 %v115_v14, %s145_s21 }
  0x5d   :  { %v32_v16 = vpop.permute.xlu2 %31  }
  0x65   :  { %v38_v17 = vpop.permute.xlu2 %37  }
  0x6d   :  { %v56_v18 = vpop.permute.xlu2 %55  }
  0x74   :  { %v8_v19 = vpop.permute.xlu0 %7   ;;  %v20_v20 = vpop.permute.xlu1 %19  }
  0x75   :  { %10 = vst.msk [vmem:[#allocation0] sm:$0x1] %vm9_vm1, %v8_v19   ;;  %v74_v21 = vpop.permute.xlu2 %73  }
  0x7c   :  { %v14_v22 = vpop.permute.xlu0 %13   ;;  %v26_v23 = vpop.permute.xlu1 %25  }
  0x7d   :  { %16 = vst.msk [vmem:[#allocation0] sm:$0x1] %vm15_vm2, %v14_v22   ;;  %v92_v24 = vpop.permute.xlu2 %91  }
  0x7e   :  { %22 = vst.msk [vmem:[#allocation0] sm:$0x1] %vm21_vm3, %v20_v20  }
  0x7f   :  { %28 = vst.msk [vmem:[#allocation0] sm:$0x1] %vm27_vm4, %v26_v23  }
  0x80   :  { %34 = vst.msk [vmem:[#allocation0] sm:$0x1] %vm33_vm5, %v32_v16  }
  0x81   :  { %40 = vst.msk [vmem:[#allocation0] sm:$0x1] %vm39_vm6, %v38_v17  }
  0x84   :  { %v44_v25 = vpop.permute.xlu0 %43   ;;  %v50_v26 = vpop.permute.xlu1 %49  }
  0x85   :  { %46 = vst.msk [vmem:[#allocation0] sm:$0x1] %vm45_vm7, %v44_v25  }
  0x86   :  { %52 = vst.msk [vmem:[#allocation0] sm:$0x1] %vm51_vm8, %v50_v26  }
  0x87   :  { %58 = vst.msk [vmem:[#allocation0] sm:$0x1] %vm57_vm9, %v56_v18  }
  0x8c   :  { %v62_v27 = vpop.permute.xlu0 %61   ;;  %v68_v28 = vpop.permute.xlu1 %67  }
  0x8d   :  { %64 = vst.msk [vmem:[#allocation0] sm:$0x1] %vm63_vm10, %v62_v27  }
  0x8e   :  { %70 = vst.msk [vmem:[#allocation0] sm:$0x1] %vm69_vm11, %v68_v28  }
  0x8f   :  { %76 = vst.msk [vmem:[#allocation0] sm:$0x1] %vm75_vm12, %v74_v21  }
  0x94   :  { %v80_v29 = vpop.permute.xlu0 %79   ;;  %v86_v30 = vpop.permute.xlu1 %85  }
  0x95   :  { %82 = vst.msk [vmem:[#allocation0] sm:$0x1] %vm81_vm13, %v80_v29  }
  0x96   :  { %88 = vst.msk [vmem:[#allocation0] sm:$0x1] %vm87_vm14, %v86_v30  }
  0x97   :  { %94 = vst.msk [vmem:[#allocation0] sm:$0x1] %vm93_vm15, %v92_v24  }
  0x9e   :  { %v97_v31 = vld [vmem:[#allocation0] sm:$0x1] }
  0x9f   :  { %100 = vst [vmem:[%s208_s1] sm:$0x1] %v97_v31 }

// kernel: conv_block.3
= control target key start
LH: loop header
LB: loop body
LE: loop exit
PB: predicated region body
PF: predicated region fallthrough
CT: control target
= control target key end

     0   :  { %9 = vsyncpa [#allocation3], 0  ;;  %s1535_s0 = inlined_call_operand.vmem [shape: f32[2,16,128], index: 0, kind: input, shape index: {}]   ;;  %s1536_s1 = inlined_call_operand.vmem [shape: f32[1,128], index: 1, kind: input, shape index: {}]   ;;  %s1537_s2 = inlined_call_operand.vmem [shape: f32[1,128], index: 2, kind: input, shape index: {}]   ;;  %s1538_s3 = inlined_call_operand.vmem [shape: f32[8,128,16], index: 3, kind: input, shape index: {}]   ;;  %s1539_s4 = inlined_call_operand.hbm [shape: f32[2,8,16,16], index: 4, kind: output, shape index: {}]  }
   0x1   :  { %11 = vsyncpa [#allocation3 + $0x1], 0  ;;  %s990_s15 = smov 0   ;;  %s992_s16 = smov 0  }
   0x2   :  { %s994_s17 = smov 0   ;;  %s996_s18 = smov 0  }
   0x3   :  { %s998_s19 = smov 0   ;;  %s1000_s20 = smov 0  }
   0x4 LB: > { %s683_s21 = sadd.s32 4294967295, %s961_s20   ;;  %s684_s22 = sadd.s32 4294967294, %s961_s20   ;;  %s961_s20 = sphi %s1000_s20, %s17_s20   ;;  %s957_s19 = sphi %s998_s19, %s1546_s19   ;;  %s953_s18 = sphi %s996_s18, %s1545_s18   ;;  %s949_s17 = sphi %s994_s17, %s1544_s17   ;;  %s945_s16 = sphi %s992_s16, %s1543_s16   ;;  %s941_s15 = sphi %s990_s15, %s1542_s15  }
   0x5   : > { %s29_s23 = sadd.s32 1, %s957_s19  ;;  %s129_s24 = sadd.s32 1, %s949_s17 }
   0x6   : > { %p31_p0 = scmp.ge.s32.totalorder %s29_s23, 2  ;;  %p139_p1 = scmp.ne.s32.totalorder %s949_s17, %s945_s16 }
   0x7   : > { %p140_p2 = scmp.eq.s32.totalorder %s683_s21, 1  ;;  %p145_p3 = scmp.ne.s32.totalorder %s945_s16, %s941_s15 }
   0x8   : > { %s1548_s23 = smov (%p31_p0, %s29_s23), 0  ;;  %p146_p5 = scmp.eq.s32.totalorder %s684_s22, 1 }
   0x9   : > { %p1030_p4 = por %p140_p2, %p139_p1  ;;  %s124_s26 = ssub.s32 %s957_s19, %s1548_s23 }
   0xa   : > { %p687_p6 = scmp.ge.s32.totalorder %s961_s20, 1  ;;  %p127_p7 = scmp.eq.s32.totalorder %s124_s26, 0 }
   0xb   : > { %p1037_p8 = por %p146_p5, %p145_p3  ;;  %p186_p9 = scmp.lt.s32.totalorder %s961_s20, 3 }
   0xc   : > { %s1043_s28 = scalar_select %p127_p7, %s949_s17, %s129_s24  }
   0xd   : > { %p187_p10 = pnand %p687_p6, %p186_p9 }
   0xe   : > { %p217_p11 = scmp.lt.s32.totalorder (!%p187_p10), %s953_s18, 1  ;;  %s213_s21 = sand.u32 (!%p187_p10), 1, %s945_s16  }
   0xf   : > { %190 = sbr.rel (%p187_p10) target bundleno = 234 (0xea), region = 36  ;;  %s688_s22 = sshll.u32 (!%p187_p10), %s213_s21, 7 }
  0x10   : > { %s1462_s24 = scalar_lea.vmem (!%p187_p10), [#allocation2], %s688_s22  ;;  %s823_s26 = sshll.u32 (!%p187_p10), %s953_s18, 7 }
  0x11   : > { %s601_s8 = sshll.u32 (!%p187_p10), %s1462_s24, 4  ;;  %s587_s9 = scalar_lea.sflag (!%p187_p10), [#allocation3], %s213_s21  ;;  %s602_s8 = int_to_ptr.vmem [resolvable:$true] %s601_s8 }
  0x14   : > { %v724_v0 = vld [vmem:[%s1538_s3 + $0x178] sm:$0xff]  ;;  %v723_v2 = vld [vmem:[%s1538_s3 + $0x170] sm:$0xff]  ;;  %v722_v4 = vld [vmem:[%s1538_s3 + $0x168] sm:$0xff]  ;;  %s1193_s29 = scalar_select %p217_p11, %s953_s18, 1  ;;  %vm282_vm0 = vcmask 130048  }
  0x15   : > { %v742_v1 = vld [vmem:[%s1538_s3 + $0x1f8] sm:$0xff]  ;;  %345 = vmatpush.msra.mxu2 %v724_v0  ;;  %v741_v3 = vld [vmem:[%s1538_s3 + $0x1f0] sm:$0xff]  ;;  %v740_v5 = vld [vmem:[%s1538_s3 + $0x1e8] sm:$0xff] }
  0x16   : > { %388 = vmatpush.msra.mxu3 %v742_v1  ;;  %v258_v6 = vld [vmem:[%s1538_s3 + $0x78] sm:$0xff]  ;;  %v257_v8 = vld [vmem:[%s1538_s3 + $0x70] sm:$0xff]  ;;  %v721_v10 = vld [vmem:[%s1538_s3 + $0x160] sm:$0xff]  ;;  %s822_s5 = sshll.u32 %s1193_s29, 4  ;;  %s903_s29 = scalar_lea.hbm %s1539_s4, 256 }
  0x17   : > { %v706_v7 = vld [vmem:[%s1538_s3 + $0xf8] sm:$0xff]  ;;  %346 = vmatpush.msra.mxu2 %v723_v2  ;;  %v705_v9 = vld [vmem:[%s1538_s3 + $0xf0] sm:$0xff]  ;;  %259 = vmatpush.msra.mxu0 %v258_v6  ;;  %v739_v11 = vld [vmem:[%s1538_s3 + $0x1e0] sm:$0xff]  ;;  %s1244_s7 = scalar_lea.vmem %s1535_s0, %s822_s5 }
  0x18   : > { %389 = vmatpush.msra.mxu3 %v741_v3  ;;  %302 = vmatpush.msra.mxu1 %v706_v7  ;;  %v256_v12 = vld [vmem:[%s1538_s3 + $0x68] sm:$0xff]  ;;  %v720_v14 = vld [vmem:[%s1538_s3 + $0x158] sm:$0xff]  ;;  %v255_v16 = vld [vmem:[%s1538_s3 + $0x60] sm:$0xff] }
  0x19   : > { %347 = vmatpush.msra.mxu2 %v722_v4  ;;  %v704_v13 = vld [vmem:[%s1538_s3 + $0xe8] sm:$0xff]  ;;  %260 = vmatpush.msra.mxu0 %v257_v8  ;;  %v738_v15 = vld [vmem:[%s1538_s3 + $0x1d8] sm:$0xff]  ;;  %v703_v17 = vld [vmem:[%s1538_s3 + $0xe0] sm:$0xff] }
  0x1a   : > { %390 = vmatpush.msra.mxu3 %v740_v5  ;;  %303 = vmatpush.msra.mxu1 %v705_v9  ;;  %v719_v18 = vld [vmem:[%s1538_s3 + $0x150] sm:$0xff]  ;;  %v254_v20 = vld [vmem:[%s1538_s3 + $0x58] sm:$0xff]  ;;  %v718_v22 = vld [vmem:[%s1538_s3 + $0x148] sm:$0xff] }
  0x1b   : > { %348 = vmatpush.msra.mxu2 %v721_v10  ;;  %261 = vmatpush.msra.mxu0 %v256_v12  ;;  %v737_v19 = vld [vmem:[%s1538_s3 + $0x1d0] sm:$0xff]  ;;  %v702_v21 = vld [vmem:[%s1538_s3 + $0xd8] sm:$0xff]  ;;  %v736_v23 = vld [vmem:[%s1538_s3 + $0x1c8] sm:$0xff] }
  0x1c   : > { %391 = vmatpush.msra.mxu3 %v739_v11  ;;  %304 = vmatpush.msra.mxu1 %v704_v13  ;;  %v253_v24 = vld [vmem:[%s1538_s3 + $0x50] sm:$0xff]  ;;  %v717_v26 = vld [vmem:[%s1538_s3 + $0x140] sm:$0xff]  ;;  %v252_v28 = vld [vmem:[%s1538_s3 + $0x48] sm:$0xff] }
  0x1d   : > { %349 = vmatpush.msra.mxu2 %v720_v14  ;;  %262 = vmatpush.msra.mxu0 %v255_v16  ;;  %v701_v25 = vld [vmem:[%s1538_s3 + $0xd0] sm:$0xff]  ;;  %v735_v27 = vld [vmem:[%s1538_s3 + $0x1c0] sm:$0xff]  ;;  %v700_v29 = vld [vmem:[%s1538_s3 + $0xc8] sm:$0xff] }
  0x1e   : > { %392 = vmatpush.msra.mxu3 %v738_v15  ;;  %305 = vmatpush.msra.mxu1 %v703_v17  ;;  %v716_v30 = vld [vmem:[%s1538_s3 + $0x138] sm:$0xff]  ;;  %v251_v32 = vld [vmem:[%s1538_s3 + $0x40] sm:$0xff]  ;;  %v715_v34 = vld [vmem:[%s1538_s3 + $0x130] sm:$0xff] }
  0x1f   : > { %350 = vmatpush.msra.mxu2 %v719_v18  ;;  %263 = vmatpush.msra.mxu0 %v254_v20  ;;  %v734_v31 = vld [vmem:[%s1538_s3 + $0x1b8] sm:$0xff]  ;;  %v699_v33 = vld [vmem:[%s1538_s3 + $0xc0] sm:$0xff]  ;;  %v733_v35 = vld [vmem:[%s1538_s3 + $0x1b0] sm:$0xff] }
  0x20   : > { %393 = vmatpush.msra.mxu3 %v737_v19  ;;  %306 = vmatpush.msra.mxu1 %v702_v21  ;;  %v250_v36 = vld [vmem:[%s1538_s3 + $0x38] sm:$0xff]  ;;  %v714_v38 = vld [vmem:[%s1538_s3 + $0x128] sm:$0xff]  ;;  %v249_v40 = vld [vmem:[%s1538_s3 + $0x30] sm:$0xff] }
  0x21   : > { %351 = vmatpush.msra.mxu2 %v718_v22  ;;  %264 = vmatpush.msra.mxu0 %v253_v24  ;;  %v698_v37 = vld [vmem:[%s1538_s3 + $0xb8] sm:$0xff]  ;;  %v732_v39 = vld [vmem:[%s1538_s3 + $0x1a8] sm:$0xff]  ;;  %v697_v41 = vld [vmem:[%s1538_s3 + $0xb0] sm:$0xff] }
  0x22   : > { %394 = vmatpush.msra.mxu3 %v736_v23  ;;  %307 = vmatpush.msra.mxu1 %v701_v25  ;;  %v713_v42 = vld [vmem:[%s1538_s3 + $0x120] sm:$0xff]  ;;  %v248_v44 = vld [vmem:[%s1538_s3 + $0x28] sm:$0xff]  ;;  %v712_v46 = vld [vmem:[%s1538_s3 + $0x118] sm:$0xff] }
  0x23   : > { %352 = vmatpush.msra.mxu2 %v717_v26  ;;  %265 = vmatpush.msra.mxu0 %v252_v28  ;;  %v731_v43 = vld [vmem:[%s1538_s3 + $0x1a0] sm:$0xff]  ;;  %v696_v45 = vld [vmem:[%s1538_s3 + $0xa8] sm:$0xff]  ;;  %v730_v47 = vld [vmem:[%s1538_s3 + $0x198] sm:$0xff] }
  0x24   : > { %395 = vmatpush.msra.mxu3 %v735_v27  ;;  %308 = vmatpush.msra.mxu1 %v700_v29  ;;  %v247_v48 = vld [vmem:[%s1538_s3 + $0x20] sm:$0xff]  ;;  %v711_v50 = vld [vmem:[%s1538_s3 + $0x110] sm:$0xff]  ;;  %v246_v52 = vld [vmem:[%s1538_s3 + $0x18] sm:$0xff] }
  0x25   : > { %353 = vmatpush.msra.mxu2 %v716_v30  ;;  %266 = vmatpush.msra.mxu0 %v251_v32  ;;  %v695_v49 = vld [vmem:[%s1538_s3 + $0xa0] sm:$0xff]  ;;  %v729_v51 = vld [vmem:[%s1538_s3 + $0x190] sm:$0xff]  ;;  %v694_v53 = vld [vmem:[%s1538_s3 + $0x98] sm:$0xff] }
  0x26   : > { %396 = vmatpush.msra.mxu3 %v734_v31  ;;  %309 = vmatpush.msra.mxu1 %v699_v33  ;;  %v710_v54 = vld [vmem:[%s1538_s3 + $0x108] sm:$0xff]  ;;  %v245_v56 = vld [vmem:[%s1538_s3 + $0x10] sm:$0xff]  ;;  %v709_v58 = vld [vmem:[%s1538_s3 + $0x100] sm:$0xff] }
  0x27   : > { %354 = vmatpush.msra.mxu2 %v715_v34  ;;  %267 = vmatpush.msra.mxu0 %v250_v36  ;;  %v728_v55 = vld [vmem:[%s1538_s3 + $0x188] sm:$0xff]  ;;  %v693_v57 = vld [vmem:[%s1538_s3 + $0x90] sm:$0xff]  ;;  %v727_v59 = vld [vmem:[%s1538_s3 + $0x180] sm:$0xff] }
  0x28   : > { %397 = vmatpush.msra.mxu3 %v733_v35  ;;  %310 = vmatpush.msra.mxu1 %v698_v37  ;;  %v796_v60 = vld [vmem:[%s1538_s3 + $0x378] sm:$0xff]  ;;  %v795_v62 = vld [vmem:[%s1538_s3 + $0x370] sm:$0xff]  ;;  %v244_v63 = vld [vmem:[%s1538_s3 + $0x8] sm:$0xff] }
  0x29   : > { %355 = vmatpush.msra.mxu2 %v714_v38  ;;  %268 = vmatpush.msra.mxu0 %v249_v40  ;;  %v814_v61 = vld [vmem:[%s1538_s3 + $0x3f8] sm:$0xff]  ;;  %v692_v0 = vld [vmem:[%s1538_s3 + $0x88] sm:$0xff]  ;;  %v813_v1 = vld [vmem:[%s1538_s3 + $0x3f0] sm:$0xff] }
  0x2a   : > { %398 = vmatpush.msra.mxu3 %v732_v39  ;;  %311 = vmatpush.msra.mxu1 %v697_v41  ;;  %v881_v2 = vld [vmem:[%s1536_s1] ss:$0 sm:$0xff]  ;;  %v794_v6 = vld [vmem:[%s1538_s3 + $0x368] sm:$0xff]  ;;  %v760_v8 = vld [vmem:[%s1538_s3 + $0x278] sm:$0xff] }
  0x2b   : > { %356 = vmatpush.msra.mxu2 %v713_v42  ;;  %269 = vmatpush.msra.mxu0 %v248_v44  ;;  %v243_v3 = vld [vmem:[%s1538_s3] sm:$0xff]  ;;  %v812_v7 = vld [vmem:[%s1538_s3 + $0x3e8] sm:$0xff]  ;;  %v778_v9 = vld [vmem:[%s1538_s3 + $0x2f8] sm:$0xff] }
  0x2c   : > { %399 = vmatpush.msra.mxu3 %v731_v43  ;;  %312 = vmatpush.msra.mxu1 %v696_v45  ;;  %v691_v4 = vld [vmem:[%s1538_s3 + $0x80] sm:$0xff]  ;;  %v759_v14 = vld [vmem:[%s1538_s3 + $0x270] sm:$0xff]  ;;  %v792_v16 = vld [vmem:[%s1538_s3 + $0x358] sm:$0xff] }
  0x2d   : > { %357 = vmatpush.msra.mxu2 %v712_v46  ;;  %270 = vmatpush.msra.mxu0 %v247_v48  ;;  %v227_v5 = vld [vmem:[%s1244_s7] sm:$0xff]  ;;  %v777_v15 = vld [vmem:[%s1538_s3 + $0x2f0] sm:$0xff]  ;;  %v810_v17 = vld [vmem:[%s1538_s3 + $0x3d8] sm:$0xff] }
  0x2e   : > { %400 = vmatpush.msra.mxu3 %v730_v47  ;;  %313 = vmatpush.msra.mxu1 %v695_v49  ;;  %v793_v10 = vld [vmem:[%s1538_s3 + $0x360] sm:$0xff]  ;;  %v233_v12 = vmul.f32 %v881_v2, %v227_v5  ;;  %v758_v18 = vld [vmem:[%s1538_s3 + $0x268] sm:$0xff]  ;;  %v791_v20 = vld [vmem:[%s1538_s3 + $0x350] sm:$0xff] }
  0x2f   : > { %358 = vmatpush.msra.mxu2 %v711_v50  ;;  %271 = vmatpush.msra.mxu0 %v246_v52  ;;  %v811_v11 = vld [vmem:[%s1538_s3 + $0x3e0] sm:$0xff]  ;;  %v776_v19 = vld [vmem:[%s1538_s3 + $0x2e8] sm:$0xff]  ;;  %v809_v21 = vld [vmem:[%s1538_s3 + $0x3d0] sm:$0xff] }
  0x30   : > { %401 = vmatpush.msra.mxu3 %v729_v51  ;;  %314 = vmatpush.msra.mxu1 %v694_v53  ;;  %v882_v13 = vld [vmem:[%s1537_s2] ss:$0 sm:$0xff]  ;;  %v790_v25 = vld [vmem:[%s1538_s3 + $0x348] sm:$0xff]  ;;  %v756_v27 = vld [vmem:[%s1538_s3 + $0x258] sm:$0xff] }
  0x31   : > { %359 = vmatpush.msra.mxu2 %v710_v54  ;;  %272 = vmatpush.msra.mxu0 %v245_v56  ;;  %v239_v22 = vadd.f32 %v882_v13, %v233_v12  ;;  %v757_v23 = vld [vmem:[%s1538_s3 + $0x260] sm:$0xff]  ;;  %v808_v26 = vld [vmem:[%s1538_s3 + $0x3c8] sm:$0xff]  ;;  %v774_v28 = vld [vmem:[%s1538_s3 + $0x2d8] sm:$0xff] }
  0x32   : > { %402 = vmatpush.msra.mxu3 %v728_v55  ;;  %315 = vmatpush.msra.mxu1 %v693_v57  ;;  %v775_v24 = vld [vmem:[%s1538_s3 + $0x2e0] sm:$0xff]  ;;  %v228_v29 = vld [vmem:[%s1244_s7 + $0x8] sm:$0xff]  ;;  %v755_v33 = vld [vmem:[%s1538_s3 + $0x250] sm:$0xff]  ;;  %s600_s7 = scalar_lea.hbm %s1539_s4, %s823_s26 }
  0x33   : > { %360 = vmatpush.msra.mxu2 %v709_v58  ;;  %273 = vmatpush.msra.mxu0 %v244_v63  ;;  %v789_v30 = vld [vmem:[%s1538_s3 + $0x340] sm:$0xff]  ;;  %v1335_v32 = vmax.f32 %v239_v22, 0.0  ;;  %v773_v34 = vld [vmem:[%s1538_s3 + $0x2d0] sm:$0xff]  ;;  %v234_v35 = vmul.f32 %v881_v2, %v228_v29  ;;  %v788_v36 = vld [vmem:[%s1538_s3 + $0x338] sm:$0xff]  ;;  %s603_s18 = sshll.u32 %s600_s7, 4  ;;  %s604_s18 = int_to_ptr.hbm [resolvable:$true] %s603_s18 }
  0x34   : > { %403 = vmatpush.msra.mxu3 %v727_v59  ;;  %316 = vmatpush.msra.mxu1 %v692_v0  ;;  %v807_v31 = vld [vmem:[%s1538_s3 + $0x3c0] sm:$0xff]  ;;  %v806_v37 = vld [vmem:[%s1538_s3 + $0x3b8] sm:$0xff]  ;;  %v754_v38 = vld [vmem:[%s1538_s3 + $0x248] sm:$0xff]  ;;  %s897_s10 = sshra.s32 %s604_s18, 4  ;;  %s898_s10 = int_to_ptr.hbm [resolvable:$true] %s897_s10 }
  0x35   : > { %517 = vmatpush.msrb.mxu2 %v796_v60  ;;  %274 = vmatpush.msra.mxu0 %v243_v3  ;;  %v772_v39 = vld [vmem:[%s1538_s3 + $0x2c8] sm:$0xff]  ;;  %v787_v40 = vld [vmem:[%s1538_s3 + $0x330] sm:$0xff]  ;;  %v753_v42 = vld [vmem:[%s1538_s3 + $0x240] sm:$0xff]  ;;  %v240_v44 = vadd.f32 %v882_v13, %v234_v35  ;;  %s899_s11 = scalar_lea.hbm %s898_s10, 128  ;;  %p904_p1 = scmp.lt.s32.totalorder %s898_s10, %s1539_s4 }
  0x36   : > { %560 = vmatpush.msrb.mxu3 %v814_v61  ;;  %317 = vmatpush.msra.mxu1 %v691_v4  ;;  %v805_v41 = vld [vmem:[%s1538_s3 + $0x3b0] sm:$0xff]  ;;  %v771_v43 = vld [vmem:[%s1538_s3 + $0x2c0] sm:$0xff]  ;;  %v786_v45 = vld [vmem:[%s1538_s3 + $0x328] sm:$0xff]  ;;  %p900_p12 = scmp.ne.s32.totalorder %s898_s10, %s899_s11  ;;  %p905_p2 = scmp.lt.s32.totalorder %s903_s29, %s899_s11 }
  0x37   : > { %518 = vmatpush.msrb.mxu2 %v795_v62  ;;  %431 = vmatpush.msrb.mxu0 %v760_v8  ;;  %v804_v46 = vld [vmem:[%s1538_s3 + $0x3a8] sm:$0xff]  ;;  %v752_v47 = vld [vmem:[%s1538_s3 + $0x238] sm:$0xff]  ;;  %v785_v49 = vld [vmem:[%s1538_s3 + $0x320] sm:$0xff]  ;;  %v242_v51 = vmax.f32 %v240_v44, 0.0 }
  0x38   : > { %561 = vmatpush.msrb.mxu3 %v813_v1  ;;  %474 = vmatpush.msrb.mxu1 %v778_v9  ;;  %v770_v48 = vld [vmem:[%s1538_s3 + $0x2b8] sm:$0xff]  ;;  %v803_v50 = vld [vmem:[%s1538_s3 + $0x3a0] sm:$0xff]  ;;  %v751_v52 = vld [vmem:[%s1538_s3 + $0x230] sm:$0xff]  ;;  %p901_p13 = pnand %p900_p12, %p1030_p4  ;;  %p906_p3 = por %p905_p2, %p904_p1 }
  0x39   : > { %519 = vmatpush.msrb.mxu2 %v794_v6  ;;  %432 = vmatpush.msrb.mxu0 %v759_v14  ;;  %v769_v53 = vld [vmem:[%s1538_s3 + $0x2b0] sm:$0xff]  ;;  %v784_v54 = vld [vmem:[%s1538_s3 + $0x318] sm:$0xff]  ;;  %v750_v56 = vld [vmem:[%s1538_s3 + $0x228] sm:$0xff] }
  0x3a   : > { %562 = vmatpush.msrb.mxu3 %v812_v7  ;;  %475 = vmatpush.msrb.mxu1 %v777_v15  ;;  %v802_v55 = vld [vmem:[%s1538_s3 + $0x398] sm:$0xff]  ;;  %v768_v57 = vld [vmem:[%s1538_s3 + $0x2a8] sm:$0xff]  ;;  %v783_v58 = vld [vmem:[%s1538_s3 + $0x310] sm:$0xff]  ;;  %p902_p0 = pneg %p901_p13 }
  0x3b   : > { %520 = vmatpush.msrb.mxu2 %v793_v10  ;;  %433 = vmatpush.msrb.mxu0 %v758_v18  ;;  %v801_v59 = vld [vmem:[%s1538_s3 + $0x390] sm:$0xff]  ;;  %v749_v60 = vld [vmem:[%s1538_s3 + $0x220] sm:$0xff]  ;;  %v782_v62 = vld [vmem:[%s1538_s3 + $0x308] sm:$0xff] }
  0x3c   : > { %563 = vmatpush.msrb.mxu3 %v811_v11  ;;  %476 = vmatpush.msrb.mxu1 %v776_v19  ;;  %v767_v61 = vld [vmem:[%s1538_s3 + $0x2a0] sm:$0xff]  ;;  %v800_v63 = vld [vmem:[%s1538_s3 + $0x388] sm:$0xff]  ;;  %v748_v0 = vld [vmem:[%s1538_s3 + $0x218] sm:$0xff]  ;;  %p907_p5 = pnand %p906_p3, %p902_p0 }
  0x3d   : > { %521 = vmatpush.msrb.mxu2 %v792_v16  ;;  %434 = vmatpush.msrb.mxu0 %v757_v23  ;;  %v766_v1 = vld [vmem:[%s1538_s3 + $0x298] sm:$0xff]  ;;  %v781_v2 = vld [vmem:[%s1538_s3 + $0x300] sm:$0xff]  ;;  %v747_v4 = vld [vmem:[%s1538_s3 + $0x210] sm:$0xff] }
  0x3e   : > { %564 = vmatpush.msrb.mxu3 %v810_v17  ;;  %477 = vmatpush.msrb.mxu1 %v775_v24  ;;  %v799_v3 = vld [vmem:[%s1538_s3 + $0x380] sm:$0xff]  ;;  %v765_v5 = vld [vmem:[%s1538_s3 + $0x290] sm:$0xff]  ;;  %v746_v6 = vld [vmem:[%s1538_s3 + $0x208] sm:$0xff] }
  0x3f   : > { %522 = vmatpush.msrb.mxu2 %v791_v20  ;;  %435 = vmatpush.msrb.mxu0 %v756_v27  ;;  %v764_v7 = vld [vmem:[%s1538_s3 + $0x288] sm:$0xff]  ;;  %v745_v8 = vld [vmem:[%s1538_s3 + $0x200] sm:$0xff] }
  0x40   : > { %565 = vmatpush.msrb.mxu3 %v809_v21  ;;  %478 = vmatpush.msrb.mxu1 %v774_v28  ;;  %v763_v9 = vld [vmem:[%s1538_s3 + $0x280] sm:$0xff] }
  0x41   : > { %523 = vmatpush.msrb.mxu2 %v790_v25  ;;  %404 = vmatmul.f32.vlgmr.msra.gmra.mxu3 %v1335_v32 }
  0x42   : > { %566 = vmatpush.msrb.mxu3 %v808_v26  ;;  %361 = vmatmul.f32.vlgmr.msra.gmra.mxu2 %v1335_v32 }
  0x43   : > { %524 = vmatpush.msrb.mxu2 %v789_v30  ;;  %436 = vmatpush.msrb.mxu0 %v755_v33 }
  0x44   : > { %567 = vmatpush.msrb.mxu3 %v807_v31  ;;  %479 = vmatpush.msrb.mxu1 %v773_v34 }
  0x45   : > { %525 = vmatpush.msrb.mxu2 %v788_v36  ;;  %437 = vmatpush.msrb.mxu0 %v754_v38 }
  0x46   : > { %568 = vmatpush.msrb.mxu3 %v806_v37  ;;  %480 = vmatpush.msrb.mxu1 %v772_v39 }
  0x47   : > { %526 = vmatpush.msrb.mxu2 %v787_v40  ;;  %438 = vmatpush.msrb.mxu0 %v753_v42 }
  0x48   : > { %569 = vmatpush.msrb.mxu3 %v805_v41  ;;  %481 = vmatpush.msrb.mxu1 %v771_v43 }
  0x49   : > { %527 = vmatpush.msrb.mxu2 %v786_v45  ;;  %275 = vmatmul.f32.vlgmr.msra.gmra.mxu0 %v1335_v32 }
  0x4a   : > { %570 = vmatpush.msrb.mxu3 %v804_v46  ;;  %318 = vmatmul.f32.vlgmr.msra.gmra.mxu1 %v1335_v32 }
  0x4b   : > { %439 = vmatpush.msrb.mxu0 %v752_v47  ;;  %482 = vmatpush.msrb.mxu1 %v770_v48 }
  0x4c   : > { %528 = vmatpush.msrb.mxu2 %v785_v49  ;;  %571 = vmatpush.msrb.mxu3 %v803_v50 }
  0x4d   : > { %364 = vmatmul.f32.gmra.mxu2 %v242_v51  ;;  %407 = vmatmul.f32.gmra.mxu3 %v242_v51 }
  0x4e   : > { %440 = vmatpush.msrb.mxu0 %v751_v52  ;;  %483 = vmatpush.msrb.mxu1 %v769_v53 }
  0x4f   : > { %529 = vmatpush.msrb.mxu2 %v784_v54  ;;  %572 = vmatpush.msrb.mxu3 %v802_v55 }
  0x50   : > { %441 = vmatpush.msrb.mxu0 %v750_v56  ;;  %484 = vmatpush.msrb.mxu1 %v768_v57 }
  0x51   : > { %530 = vmatpush.msrb.mxu2 %v783_v58  ;;  %573 = vmatpush.msrb.mxu3 %v801_v59 }
  0x52   : > { %442 = vmatpush.msrb.mxu0 %v749_v60  ;;  %485 = vmatpush.msrb.mxu1 %v767_v61 }
  0x53   : > { %531 = vmatpush.msrb.mxu2 %v782_v62  ;;  %574 = vmatpush.msrb.mxu3 %v800_v63 }
  0x54   : > { %278 = vmatmul.f32.gmra.mxu0 %v242_v51  ;;  %321 = vmatmul.f32.gmra.mxu1 %v242_v51 }
  0x55   : > { %443 = vmatpush.msrb.mxu0 %v748_v0  ;;  %486 = vmatpush.msrb.mxu1 %v766_v1 }
  0x56   : > { %532 = vmatpush.msrb.mxu2 %v781_v2  ;;  %575 = vmatpush.msrb.mxu3 %v799_v3 }
  0x57   : > { %533 = vmatmul.f32.vlgmr.msrb.gmra.mxu2 %v1335_v32  ;;  %576 = vmatmul.f32.vlgmr.msrb.gmra.mxu3 %v1335_v32 }
  0x58   : > { %444 = vmatpush.msrb.mxu0 %v747_v4  ;;  %487 = vmatpush.msrb.mxu1 %v765_v5 }
  0x5a   : > { %445 = vmatpush.msrb.mxu0 %v746_v6  ;;  %488 = vmatpush.msrb.mxu1 %v764_v7 }
  0x5c   : > { %446 = vmatpush.msrb.mxu0 %v745_v8  ;;  %489 = vmatpush.msrb.mxu1 %v763_v9 }
  0x5d   : > { %447 = vmatmul.f32.vlgmr.msrb.gmra.mxu0 %v1335_v32  ;;  %490 = vmatmul.f32.vlgmr.msrb.gmra.mxu1 %v1335_v32 }
  0x5f   : > { %536 = vmatmul.f32.gmra.mxu2 %v242_v51  ;;  %579 = vmatmul.f32.gmra.mxu3 %v242_v51 }
  0x65   : > { %450 = vmatmul.f32.gmra.mxu0 %v242_v51  ;;  %493 = vmatmul.f32.gmra.mxu1 %v242_v51 }
  0xc4   : > { %v405_v11 = vpop.f32.mrf.mxu3 }
  0xc5   : > { %v362_v10 = vpop.f32.mrf.mxu2  ;;  %743 = vst.msk [vmem:[%s1462_s24 + $0x30] sm:$0xff] %vm282_vm0, %v405_v11 }
  0xc6   : > { %v276_v12 = vpop.f32.mrf.mxu0  ;;  %725 = vst.msk [vmem:[%s1462_s24 + $0x20] sm:$0xff] %vm282_vm0, %v362_v10 }
  0xc7   : > { %v319_v13 = vpop.f32.mrf.mxu1  ;;  %283 = vst.msk [vmem:[%s1462_s24] sm:$0xff] %vm282_vm0, %v276_v12 }
  0xc8   : > { %707 = vst.msk [vmem:[%s1462_s24 + $0x10] sm:$0xff] %vm282_vm0, %v319_v13 }
  0xd0   : > { %v365_v14 = vpop.f32.mrf.mxu2  ;;  %v408_v15 = vpop.f32.mrf.mxu3 }
  0xd1   : > { %v279_v16 = vpop.f32.mrf.mxu0  ;;  %v322_v17 = vpop.f32.mrf.mxu1  ;;  %726 = vst.msk [vmem:[%s1462_s24 + $0x28] sm:$0xff] %vm282_vm0, %v365_v14 }
  0xd2   : > { %284 = vst.msk [vmem:[%s1462_s24 + $0x8] sm:$0xff] %vm282_vm0, %v279_v16 }
  0xd3   : > { %708 = vst.msk [vmem:[%s1462_s24 + $0x18] sm:$0xff] %vm282_vm0, %v322_v17 }
  0xd4   : > { %744 = vst.msk [vmem:[%s1462_s24 + $0x38] sm:$0xff] %vm282_vm0, %v408_v15 }
  0xda   : > { %v448_v18 = vpop.f32.mrf.mxu0  ;;  %v491_v19 = vpop.f32.mrf.mxu1 }
  0xdb   : > { %761 = vst.msk [vmem:[%s1462_s24 + $0x40] sm:$0xff] %vm282_vm0, %v448_v18  ;;  %v534_v20 = vpop.f32.mrf.mxu2  ;;  %v577_v21 = vpop.f32.mrf.mxu3 }
  0xdc   : > { %779 = vst.msk [vmem:[%s1462_s24 + $0x50] sm:$0xff] %vm282_vm0, %v491_v19 }
  0xdd   : > { %797 = vst.msk [vmem:[%s1462_s24 + $0x60] sm:$0xff] %vm282_vm0, %v534_v20 }
  0xde   : > { %815 = vst.msk [vmem:[%s1462_s24 + $0x70] sm:$0xff] %vm282_vm0, %v577_v21 }
  0xe2   : > { %v451_v22 = vpop.f32.mrf.mxu0  ;;  %v494_v23 = vpop.f32.mrf.mxu1 }
  0xe3   : > { %762 = vst.msk [vmem:[%s1462_s24 + $0x48] sm:$0xff] %vm282_vm0, %v451_v22  ;;  %v537_v24 = vpop.f32.mrf.mxu2  ;;  %v580_v25 = vpop.f32.mrf.mxu3 }
  0xe4   : > { %780 = vst.msk [vmem:[%s1462_s24 + $0x58] sm:$0xff] %vm282_vm0, %v494_v23 }
  0xe5   : > { %798 = vst.msk [vmem:[%s1462_s24 + $0x68] sm:$0xff] %vm282_vm0, %v537_v24 }
  0xe6   : > { %816 = vst.msk [vmem:[%s1462_s24 + $0x78] sm:$0xff] %vm282_vm0, %v580_v25 }
  0xe7   : > { %910 = shalt.err (!%p907_p5)
}
  0xe8   : > { %s963_s21 = smov 128   ;;  %s964_s22 = smov 8  }
  0xe9   : > { %824 = dma.vmem_to_hbm [thread:$0]  (%p1030_p4), %s602_s8, 2048, %s604_s18, %s587_s9, %s963_s21, %s963_s21, %s964_s22  }
  0xea PF: > { %p830_p6 = scmp.ge.s32.totalorder %s961_s20, 2  ;;  %s618_s24 = sand.u32 1, %s941_s15  }
  0xeb   : > { %s619_s26 = scalar_lea.sflag [#allocation3], %s618_s24 }
  0xec   : > { %p827_p7 = pnand %p830_p6, %p1037_p8 }
  0xee   : > { %p828_p9 = pneg %p827_p7 }
  0xf0   : > { %936 = dma.done.wait (%p828_p9), %s619_s26, 2048  }
  0xf1   : > { %938 = vsyncadd (%p828_p9), %s619_s26, 4294965248  ;;  %s17_s20 = sadd.s32 1, %s961_s20   ;;  %s1542_s15 = smov %s945_s16 }
  0xf2   : > { %p14_p10 = scmp.ge.s32.totalorder %s17_s20, 4   ;;  %s1543_s16 = smov %s949_s17 }
  0xf3   : > { %s1544_s17 = smov %s1043_s28  ;;  %s1545_s18 = smov %s957_s19 }
  0xf4   : > { %s1546_s19 = smov %s1548_s23  ;;  %16 = sbr.rel (!%p14_p10) target bundleno = 4 (0x4), region = 85 }
  0xf9   :  { %625 = vsyncpa [#allocation3], 1 }
  0xfa   :  { %627 = vsyncpa [#allocation3 + $0x1], 1 }

</bundles_post_ra>
